<compile_context>
chip_gen: v6e
topology: v6e:2x2x1
jax: 0.10.0
libtpu: 0.0.40
codegen_flags: <defaults>
</compile_context>

<pallas_src>
import functools

import jax
import jax.numpy as jnp
from jax.experimental import pallas as pl
from jax.experimental.pallas import tpu as pltpu


# ----------------------------------------------------------------------------
# Kernels
# ----------------------------------------------------------------------------
def _layernorm(v, g, b, eps):
    mu = jnp.mean(v, axis=-1, keepdims=True)
    var = jnp.mean(jnp.square(v - mu), axis=-1, keepdims=True)
    return (v - mu) * jax.lax.rsqrt(var + eps) * g + b


def _embed_kernel(x_ref, w_ref, b_ref, cls_ref, pos_ref, o_ref, *, n_patches, s_pad):
    # Patch-embed matmul (bf16 operands, f32 acc) + bias, fused with the
    # cls-token prepend, positional-embedding add and sublane padding.
    tok = (jnp.dot(x_ref[0], w_ref[...], preferred_element_type=jnp.float32)
           + b_ref[...] + pos_ref[1:1 + n_patches, :])                # (N, D) f32
    o_ref[0, 0:1, :] = (cls_ref[...] + pos_ref[0:1, :]).astype(o_ref.dtype)
    o_ref[0, 1:1 + n_patches, :] = tok.astype(o_ref.dtype)
    if s_pad > n_patches + 1:
        # zero the padded rows so later blocks only ever see finite values
        o_ref[0, 1 + n_patches:, :] = jnp.zeros(
            (s_pad - n_patches - 1, tok.shape[1]), o_ref.dtype)


def _vit_block_kernel(x_ref, g1_ref, b1_ref,
                      wqkv_ref, bqkv_ref, wproj_ref, bproj_ref,
                      g2_ref, b2_ref, w1_ref, bfc1_ref, w2_ref, bfc2_ref,
                      o_ref, *, num_heads, s_valid, eps):
    x = x_ref[0]                                                     # (S, D) f32
    S, D = x.shape
    H = num_heads
    hd = D // H

    # ---- Attention branch: x = x + proj(concat_h attn_h(norm1(x))) ----
    xn = _layernorm(x, g1_ref[...], b1_ref[...], eps).astype(jnp.bfloat16)
    # Fused QKV: one lane-dense (S,D)@(D,3D) MXU matmul; attention scale already
    # folded into the q third of wqkv/bqkv on the host.
    qkv = (jnp.dot(xn, wqkv_ref[...], preferred_element_type=jnp.float32)
           + bqkv_ref[...])                                          # (S, 3D) f32

    def split_heads(m):                                              # (S, D) -> (H, S, hd)
        return m.reshape(S, H, hd).transpose(1, 0, 2).astype(jnp.bfloat16)

    q = split_heads(qkv[:, 0 * D:1 * D])
    k = split_heads(qkv[:, 1 * D:2 * D])
    v = split_heads(qkv[:, 2 * D:3 * D])

    s = jnp.einsum('hse,hte->hst', q, k,
                   preferred_element_type=jnp.float32)               # (H, S, S)
    if s_valid < S:
        # mask padded key columns so softmax statistics ignore the padding rows
        key_ok = jax.lax.broadcasted_iota(jnp.int32, (1, 1, S), 2) < s_valid
        s = jnp.where(key_ok, s, -1e30)
    s = s - jnp.max(s, axis=-1, keepdims=True)
    p = jnp.exp(s)
    p = p * pl.reciprocal(jnp.sum(p, axis=-1, keepdims=True), approx=True)

    attn = jnp.einsum('hst,hte->hse', p.astype(jnp.bfloat16), v,
                      preferred_element_type=jnp.float32)            # (H, S, hd)
    attn = attn.transpose(1, 0, 2).reshape(S, D)                     # head concat (S, D)
    # Output projection: single full-width (S,D)@(D,D) matmul (head-concat folded
    # into the reshape above; no per-head partials, no cross-head reduction).
    x = x + (jnp.dot(attn.astype(jnp.bfloat16), wproj_ref[...],
                     preferred_element_type=jnp.float32)
             + bproj_ref[...])

    # ---- MLP branch: x = x + fc2(gelu(fc1(norm2(x)))) ----
    xn2 = _layernorm(x, g2_ref[...], b2_ref[...], eps)
    h1 = jnp.dot(xn2.astype(jnp.bfloat16), w1_ref[...],
                 preferred_element_type=jnp.float32) + bfc1_ref[...]
    # TODO(synk): timm's nn.GELU is exact (erf); tanh approximation is used here.
    h1 = jax.nn.gelu(h1, approximate=True)
    x = x + jnp.dot(h1.astype(jnp.bfloat16), w2_ref[...],
                    preferred_element_type=jnp.float32) + bfc2_ref[...]

    o_ref[0] = x.astype(o_ref.dtype)


def _head_kernel(x_ref, g_ref, b_ref, wh_ref, bh_ref, o_ref, *, eps):
    # final LayerNorm on the cls token + linear head
    xn = _layernorm(x_ref[0], g_ref[...], b_ref[...], eps)            # (1, D)
    o_ref[...] = (jnp.dot(xn.astype(jnp.bfloat16), wh_ref[...],
                          preferred_element_type=jnp.float32)
                  + bh_ref[...]).astype(o_ref.dtype)


# ----------------------------------------------------------------------------
# Pallas wrappers
# ----------------------------------------------------------------------------
def patch_embed(xp, w, b, cls_tok, pos, *, s_pad):
    B, N, K = xp.shape
    D = w.shape[1]
    kern = functools.partial(_embed_kernel, n_patches=N, s_pad=s_pad)
    return pl.pallas_call(
        kern,
        out_shape=jax.ShapeDtypeStruct((B, s_pad, D), jnp.float32),
        grid=(B,),
        in_specs=[pl.BlockSpec((1, N, K), lambda i: (i, 0, 0)),
                  pl.BlockSpec((K, D), lambda i: (0, 0)),
                  pl.BlockSpec((1, D), lambda i: (0, 0)),
                  pl.BlockSpec((1, D), lambda i: (0, 0)),
                  pl.BlockSpec((s_pad, D), lambda i: (0, 0))],
        out_specs=pl.BlockSpec((1, s_pad, D), lambda i: (i, 0, 0)),
        compiler_params=pltpu.CompilerParams(dimension_semantics=("parallel",)),
    )(xp, w, b, cls_tok, pos)


def vit_block(x, blk, *, num_heads, s_valid, eps):
    B, S, D = x.shape
    hidden = blk['w1'].shape[1]
    kern = functools.partial(_vit_block_kernel, num_heads=num_heads,
                             s_valid=s_valid, eps=eps)
    args = (x, blk['g1'], blk['b1'],
            blk['wqkv'], blk['bqkv'], blk['wproj'], blk['bproj'],
            blk['g2'], blk['b2'],
            blk['w1'], blk['bfc1'], blk['w2'], blk['bfc2'])

    def build(single_buffer_weights):
        def cst(shape):
            # constant-index weight block: the batch grid revisits the same tile
            # every step, so there is nothing to prefetch -> single-buffer it to
            # halve weight VMEM residency (matters at ViT-Base on v7x's 64 MiB).
            n = len(shape)
            kw = ({'pipeline_mode': pl.Buffered(1)}
                  if single_buffer_weights else {})
            return pl.BlockSpec(shape, lambda b, n=n: (0,) * n, **kw)

        in_specs = [pl.BlockSpec((1, S, D), lambda b: (b, 0, 0)),
                    cst((1, D)), cst((1, D)),                          # ln1
                    cst((D, 3 * D)), cst((1, 3 * D)),                  # fused qkv
                    cst((D, D)), cst((1, D)),                          # proj
                    cst((1, D)), cst((1, D)),                          # ln2
                    cst((D, hidden)), cst((1, hidden)),                # fc1
                    cst((hidden, D)), cst((1, D))]                     # fc2

        return pl.pallas_call(
            kern,
            out_shape=jax.ShapeDtypeStruct((B, S, D), x.dtype),
            grid=(B,),
            in_specs=in_specs,
            out_specs=pl.BlockSpec((1, S, D), lambda b: (b, 0, 0)),
            compiler_params=pltpu.CompilerParams(
                dimension_semantics=("parallel",),
                # 48 MiB fits under v7x's 64 MiB physical VMEM with headroom and is
                # already a raise over the v5e/v6e scoped defaults.  At real
                # ViT-Base/Large scale on v6e raise to 64-96 MiB, or tile the MLP
                # hidden axis if weights still crowd VMEM.
                vmem_limit_bytes=48 * 1024 * 1024),
        )

    try:
        return build(True)(*args)
    except Exception:
        # Fallback for JAX builds where BlockSpec.pipeline_mode / pl.Buffered(1)
        # is not supported by the Mosaic grid pipeliner.
        return build(False)(*args)


def head(cls_tokens, g, b, wh, bh, *, eps):
    B, _, D = cls_tokens.shape
    nc = wh.shape[1]
    kern = functools.partial(_head_kernel, eps=eps)
    return pl.pallas_call(
        kern,
        out_shape=jax.ShapeDtypeStruct((B, nc), jnp.float32),
        grid=(B,),
        in_specs=[pl.BlockSpec((1, 1, D), lambda i: (i, 0, 0)),   # only the cls row
                  pl.BlockSpec((1, D), lambda i: (0, 0)),
                  pl.BlockSpec((1, D), lambda i: (0, 0)),
                  pl.BlockSpec((D, nc), lambda i: (0, 0)),
                  pl.BlockSpec((1, nc), lambda i: (0, 0))],
        out_specs=pl.BlockSpec((1, nc), lambda i: (i, 0)),
        compiler_params=pltpu.CompilerParams(dimension_semantics=("parallel",)),
    )(cls_tokens, g, b, wh, bh)


# ----------------------------------------------------------------------------
# Full forward (patch embed + cls + pos  ->  blocks  ->  final norm + head)
# ----------------------------------------------------------------------------
def vit_forward(x, kp, *, patch=16, num_heads=4, eps=1e-6):
    B, C, Hh, Ww = x.shape
    gh, gw = Hh // patch, Ww // patch
    N = gh * gw
    s_valid = N + 1
    s_pad = kp['pos'].shape[0]
    assert s_pad >= s_valid

    # patchify (glue): (B,C,H,W) -> (B, N, C*P*P), rows flattened in (C, P, P) order
    xp = x.reshape(B, C, gh, patch, gw, patch)
    xp = xp.transpose(0, 2, 4, 1, 3, 5).reshape(B, N, C * patch * patch)
    xp = xp.astype(jnp.bfloat16)

    seq = patch_embed(xp, kp['patch_w'], kp['patch_b'], kp['cls'], kp['pos'],
                      s_pad=s_pad)                                   # (B, s_pad, D)

    for blk in kp['blocks']:
        seq = vit_block(seq, blk, num_heads=num_heads, s_valid=s_valid, eps=eps)

    cls_tokens = seq[:, 0:1, :]   # host slice: head kernel only DMAs the cls row
    return head(cls_tokens, kp['norm_g'], kp['norm_b'],
                kp['head_w'], kp['head_b'], eps=eps)


# ----------------------------------------------------------------------------
# Host-side parameter preparation: fused-QKV layout, scale folding, bf16 weights
# ----------------------------------------------------------------------------
def prepare_params(params, *, num_heads, head_dim):
    D = num_heads * head_dim
    scale = head_dim ** -0.5
    bf = jnp.bfloat16

    s_real = params['pos'].shape[1]
    s_pad = ((s_real + 7) // 8) * 8
    pos = jnp.zeros((s_pad, D), jnp.float32).at[:s_real].set(params['pos'][0])

    kp = {
        'patch_w': params['patch_w'].astype(bf),
        'patch_b': params['patch_b'],
        'cls':     params['cls'].reshape(1, D),
        'pos':     pos,
        'norm_g':  params['norm_g'],
        'norm_b':  params['norm_b'],
        'head_w':  params['head_w'].astype(bf),
        'head_b':  params['head_b'],
        'blocks':  [],
    }
    # attention scale folded into the q third of the fused QKV weight/bias
    q_scale = jnp.concatenate([jnp.full((D,), scale, jnp.float32),
                               jnp.ones((2 * D,), jnp.float32)])[None, :]   # (1, 3D)
    for blk in params['blocks']:
        kp['blocks'].append({
            'g1': blk['g1'], 'b1': blk['b1'],
            'wqkv': (blk['wqkv'] * q_scale).astype(bf),     # (D, 3D) fused, lane-dense
            'bqkv': blk['bqkv'] * q_scale,                  # (1, 3D)
            'wproj': blk['wproj'].astype(bf),               # (D, D) kept un-split
            'bproj': blk['bproj'],
            'g2': blk['g2'], 'b2': blk['b2'],
            'w1': blk['w1'].astype(bf), 'bfc1': blk['bfc1'],
            'w2': blk['w2'].astype(bf), 'bfc2': blk['bfc2'],
        })
    return kp


# ----------------------------------------------------------------------------
# Deterministic parameter init (synthetic; timm pretrained weights not loaded)
# ----------------------------------------------------------------------------
def init_params(key, *, in_chans=3, patch=16, num_patches=4, D=64,
                depth=2, mlp_ratio=4, num_classes=16):
    def nrm(k, shape):
        return (0.02 * jax.random.normal(k, shape)).astype(jnp.float32)

    keys = jax.random.split(key, 4 + depth)
    params = {
        'patch_w': nrm(keys[0], (in_chans * patch * patch, D)),
        'patch_b': jnp.zeros((1, D), jnp.float32),
        'cls':     nrm(keys[1], (1, 1, D)),
        'pos':     nrm(keys[2], (1, num_patches + 1, D)),
        'norm_g':  jnp.ones((1, D), jnp.float32),
        'norm_b':  jnp.zeros((1, D), jnp.float32),
        'head_w':  nrm(keys[3], (D, num_classes)),
        'head_b':  jnp.zeros((1, num_classes), jnp.float32),
        'blocks':  [],
    }
    hidden = mlp_ratio * D
    for i in range(depth):
        bks = jax.random.split(keys[4 + i], 4)
        params['blocks'].append({
            'g1':    jnp.ones((1, D), jnp.float32),
            'b1':    jnp.zeros((1, D), jnp.float32),
            'wqkv':  nrm(bks[0], (D, 3 * D)),
            'bqkv':  jnp.zeros((1, 3 * D), jnp.float32),
            'wproj': nrm(bks[1], (D, D)),
            'bproj': jnp.zeros((1, D), jnp.float32),
            'g2':    jnp.ones((1, D), jnp.float32),
            'b2':    jnp.zeros((1, D), jnp.float32),
            'w1':    nrm(bks[2], (D, hidden)),
            'bfc1':  jnp.zeros((1, hidden), jnp.float32),
            'w2':    nrm(bks[3], (hidden, D)),
            'bfc2':  jnp.zeros((1, D), jnp.float32),
        })
    return params


if __name__ == "__main__":
    key = jax.random.PRNGKey(0)
    k_img, k_par = jax.random.split(key)

    # small ViT config: patch=16, 32x32 image -> 4 patches (+cls = 5 tokens,
    # padded to 8), D=64, 4 heads x 16, depth=2, 16 classes.
    B, C, H, W = 2, 3, 32, 32
    patch, heads, hd, depth, ncls = 16, 4, 16, 2, 16
    D = heads * hd

    x = jax.random.normal(k_img, (B, C, H, W), dtype=jnp.float32)
    params = init_params(k_par, in_chans=C, patch=patch,
                         num_patches=(H // patch) * (W // patch),
                         D=D, depth=depth, mlp_ratio=4, num_classes=ncls)
    kp = prepare_params(params, num_heads=heads, head_dim=hd)

    out = vit_forward(x, kp, patch=patch, num_heads=heads, eps=1e-6)
    out = jax.block_until_ready(out)

    assert out.shape == (B, ncls), out.shape
    assert bool(jnp.all(jnp.isfinite(out)))
    print("KERNEL_OK")
</pallas_src>

<mosaic_0001>
module attributes {stable_mosaic.version = 11 : i64} {
  func.func @_embed_kernel(%arg0: i32, %arg1: memref<1x4x768xbf16, #tpu.memory_space<vmem>>, %arg2: memref<768x64xbf16, #tpu.memory_space<vmem>>, %arg3: memref<1x64xf32, #tpu.memory_space<vmem>>, %arg4: memref<1x64xf32, #tpu.memory_space<vmem>>, %arg5: memref<8x64xf32, #tpu.memory_space<vmem>>, %arg6: memref<1x8x64xf32, #tpu.memory_space<vmem>>) attributes {dimension_semantics = [#tpu.dimension_semantics<parallel>], iteration_bounds = array<i64: 2>, scalar_prefetch = 0 : i64, scratch_operands = 0 : i64, tpu.core_type = #tpu.core_type<tc>, window_params = [{transform_indices = @transform_0, window_bounds = array<i64: 1, 4, 768>}, {pipeline_mode = #tpu.pipeline_mode<synchronous>, transform_indices = @transform_1, window_bounds = array<i64: 768, 64>}, {pipeline_mode = #tpu.pipeline_mode<synchronous>, transform_indices = @transform_2, window_bounds = array<i64: 1, 64>}, {pipeline_mode = #tpu.pipeline_mode<synchronous>, transform_indices = @transform_3, window_bounds = array<i64: 1, 64>}, {pipeline_mode = #tpu.pipeline_mode<synchronous>, transform_indices = @transform_4, window_bounds = array<i64: 8, 64>}, {transform_indices = @transform_5, window_bounds = array<i64: 1, 8, 64>}]} {
    %c0 = arith.constant 0 : index
    %c0_0 = arith.constant 0 : index
    %c0_1 = arith.constant 0 : index
    %0 = vector.load %arg1[%c0, %c0_0, %c0_1] : memref<1x4x768xbf16, #tpu.memory_space<vmem>>, vector<1x4x768xbf16>
    %1 = vector.shape_cast %0 : vector<1x4x768xbf16> to vector<4x768xbf16>
    %c0_2 = arith.constant 0 : index
    %c0_3 = arith.constant 0 : index
    %2 = vector.load %arg2[%c0_2, %c0_3] : memref<768x64xbf16, #tpu.memory_space<vmem>>, vector<768x64xbf16>
    %cst = arith.constant dense<0.000000e+00> : vector<4x64xf32>
    %3 = tpu.matmul %1, %2, %cst {dimension_numbers = #tpu.dot_dimension_numbers<[1], [0], [0], [1], [0, 0, 1, 1], [], []>} : vector<4x768xbf16>, vector<768x64xbf16>, vector<4x64xf32> -> vector<4x64xf32>
    %c0_4 = arith.constant 0 : index
    %c0_5 = arith.constant 0 : index
    %4 = vector.load %arg3[%c0_4, %c0_5] : memref<1x64xf32, #tpu.memory_space<vmem>>, vector<1x64xf32>
    %5 = vector.broadcast %4 : vector<1x64xf32> to vector<4x64xf32>
    %6 = arith.addf %3, %5 : vector<4x64xf32>
    %c1 = arith.constant 1 : index
    %c0_6 = arith.constant 0 : index
    %7 = vector.load %arg5[%c1, %c0_6] : memref<8x64xf32, #tpu.memory_space<vmem>>, vector<4x64xf32>
    %8 = arith.addf %6, %7 : vector<4x64xf32>
    %c0_7 = arith.constant 0 : index
    %c0_8 = arith.constant 0 : index
    %9 = vector.load %arg4[%c0_7, %c0_8] : memref<1x64xf32, #tpu.memory_space<vmem>>, vector<1x64xf32>
    %c0_9 = arith.constant 0 : index
    %c0_10 = arith.constant 0 : index
    %10 = vector.load %arg5[%c0_9, %c0_10] : memref<8x64xf32, #tpu.memory_space<vmem>>, vector<1x64xf32>
    %11 = arith.addf %9, %10 : vector<1x64xf32>
    %c0_11 = arith.constant 0 : index
    %c0_12 = arith.constant 0 : index
    %c0_13 = arith.constant 0 : index
    %12 = vector.load %arg6[%c0_11, %c0_12, %c0_13] : memref<1x8x64xf32, #tpu.memory_space<vmem>>, vector<1x1x64xf32>
    %13 = vector.shape_cast %12 : vector<1x1x64xf32> to vector<1x64xf32>
    %14 = vector.shape_cast %11 : vector<1x64xf32> to vector<1x1x64xf32>
    tpu.vector_store %arg6[%c0_11, %c0_12, %c0_13], %14 {strides = array<i32>} : memref<1x8x64xf32, #tpu.memory_space<vmem>>, vector<1x1x64xf32>,
    %c0_14 = arith.constant 0 : index
    %c1_15 = arith.constant 1 : index
    %c0_16 = arith.constant 0 : index
    %15 = vector.load %arg6[%c0_14, %c1_15, %c0_16] : memref<1x8x64xf32, #tpu.memory_space<vmem>>, vector<1x4x64xf32>
    %16 = vector.shape_cast %15 : vector<1x4x64xf32> to vector<4x64xf32>
    %17 = vector.shape_cast %8 : vector<4x64xf32> to vector<1x4x64xf32>
    tpu.vector_store %arg6[%c0_14, %c1_15, %c0_16], %17 {strides = array<i32>} : memref<1x8x64xf32, #tpu.memory_space<vmem>>, vector<1x4x64xf32>,
    %cst_17 = arith.constant 0.000000e+00 : f32
    %18 = vector.broadcast %cst_17 : f32 to vector<3x64xf32>
    %c0_18 = arith.constant 0 : index
    %c5 = arith.constant 5 : index
    %c0_19 = arith.constant 0 : index
    %19 = vector.load %arg6[%c0_18, %c5, %c0_19] : memref<1x8x64xf32, #tpu.memory_space<vmem>>, vector<1x3x64xf32>
    %20 = vector.shape_cast %19 : vector<1x3x64xf32> to vector<3x64xf32>
    %21 = vector.shape_cast %18 : vector<3x64xf32> to vector<1x3x64xf32>
    tpu.vector_store %arg6[%c0_18, %c5, %c0_19], %21 {strides = array<i32>} : memref<1x8x64xf32, #tpu.memory_space<vmem>>, vector<1x3x64xf32>,
    return
  }
  func.func @transform_0(%arg0: i32) -> (i32, i32, i32) {
    %c0_i32 = arith.constant 0 : i32
    %c0_i32_0 = arith.constant 0 : i32
    %c0_i32_1 = arith.constant 0 : i32
    return %arg0, %c0_i32, %c0_i32_0 : i32, i32, i32
  }
  func.func @transform_1(%arg0: i32) -> (i32, i32) {
    %c0_i32 = arith.constant 0 : i32
    %c0_i32_0 = arith.constant 0 : i32
    %c0_i32_1 = arith.constant 0 : i32
    return %c0_i32, %c0_i32_0 : i32, i32
  }
  func.func @transform_2(%arg0: i32) -> (i32, i32) {
    %c0_i32 = arith.constant 0 : i32
    %c0_i32_0 = arith.constant 0 : i32
    %c0_i32_1 = arith.constant 0 : i32
    return %c0_i32, %c0_i32_0 : i32, i32
  }
  func.func @transform_3(%arg0: i32) -> (i32, i32) {
    %c0_i32 = arith.constant 0 : i32
    %c0_i32_0 = arith.constant 0 : i32
    %c0_i32_1 = arith.constant 0 : i32
    return %c0_i32, %c0_i32_0 : i32, i32
  }
  func.func @transform_4(%arg0: i32) -> (i32, i32) {
    %c0_i32 = arith.constant 0 : i32
    %c0_i32_0 = arith.constant 0 : i32
    %c0_i32_1 = arith.constant 0 : i32
    return %c0_i32, %c0_i32_0 : i32, i32
  }
  func.func @transform_5(%arg0: i32) -> (i32, i32, i32) {
    %c0_i32 = arith.constant 0 : i32
    %c0_i32_0 = arith.constant 0 : i32
    %c0_i32_1 = arith.constant 0 : i32
    return %arg0, %c0_i32, %c0_i32_0 : i32, i32, i32
  }
}

</mosaic_0001>

<bundles_post_ra>
// kernel: tpu_custom_call.1
= control target key start
LH: loop header
LB: loop body
LE: loop exit
PB: predicated region body
PF: predicated region fallthrough
CT: control target
= control target key end

     0   :  { %10 = vsyncpa [#allocation3], 0  ;;  %s1423_s0 = inlined_call_operand.vmem [shape: bf16[2,4,768], index: 0, kind: input, shape index: {}]   ;;  %s1424_s1 = inlined_call_operand.vmem [shape: bf16[768,64], index: 1, kind: input, shape index: {}]   ;;  %s1425_s2 = inlined_call_operand.vmem [shape: f32[1,64], index: 2, kind: input, shape index: {}]   ;;  %s1426_s3 = inlined_call_operand.vmem [shape: f32[1,64], index: 3, kind: input, shape index: {}]   ;;  %s1427_s4 = inlined_call_operand.vmem [shape: f32[8,64], index: 4, kind: input, shape index: {}]   ;;  %s1428_s5 = inlined_call_operand.hbm [shape: f32[2,8,64], index: 5, kind: output, shape index: {}]  }
   0x1   :  { %12 = vsyncpa [#allocation3 + $0x1], 0  ;;  %s1166_s18 = smov 0   ;;  %s1168_s19 = smov 0  }
   0x2   :  { %s1170_s20 = smov 0   ;;  %s1172_s21 = smov 0  }
   0x3 LB: > { %s1187_s22 = sadd.s32 4294967295, %s1131_s21   ;;  %s854_s23 = sadd.s32 4294967294, %s1131_s21   ;;  %s1131_s21 = sphi %s1172_s21, %s1434_s21   ;;  %s1127_s20 = sphi %s1170_s20, %s1433_s20   ;;  %s1123_s19 = sphi %s1168_s19, %s1432_s19   ;;  %s1119_s18 = sphi %s1166_s18, %s1431_s18  }
   0x4   : > { %s1191_s24 = sadd.s32 1, %s1131_s21   ;;  %s135_s25 = sadd.s32 1, %s1127_s20 }
   0x5   : > { %s132_s26 = ssub.s32 %s1131_s21, %s1191_s24  ;;  %p145_p0 = scmp.ne.s32.totalorder %s1127_s20, %s1123_s19 }
   0x6   : > { %p133_p1 = scmp.eq.s32.totalorder %s132_s26, 0  ;;  %p146_p2 = scmp.eq.s32.totalorder %s1187_s22, 1 }
   0x7   : > { %p151_p3 = scmp.ne.s32.totalorder %s1123_s19, %s1119_s18  ;;  %p152_p4 = scmp.eq.s32.totalorder %s854_s23, 1 }
   0x8   : > { %s1202_s27 = scalar_select %p133_p1, %s1127_s20, %s135_s25  }
   0x9   : > { %p1204_p5 = por %p146_p2, %p145_p0  ;;  %p1208_p6 = por %p152_p4, %p151_p3 }
   0xa   : > { %p857_p7 = scmp.ge.s32.totalorder %s1131_s21, 1  ;;  %p190_p8 = scmp.lt.s32.totalorder %s1131_s21, 3 }
   0xc   : > { %p191_p9 = pnand %p857_p7, %p190_p8 }
   0xd   : > { %p218_p10 = scmp.lt.s32.totalorder (!%p191_p9), %s1187_s22, 1  ;;  %s215_s11 = sand.u32 (!%p191_p9), 1, %s1123_s19  }
   0xe   : > { %194 = sbr.rel (%p191_p9) target bundleno = 298 (0x12a), region = 40  ;;  %s858_s12 = sshll.u32 (!%p191_p9), %s215_s11, 3 }
   0xf   : > { %s1376_s17 = scalar_lea.vmem (!%p191_p9), [#allocation2], %s858_s12  ;;  %s911_s6 = sshll.u32 (!%p191_p9), %s1187_s22, 7 }
  0x10   : > { %s795_s7 = sshll.u32 (!%p191_p9), %s1376_s17, 4  ;;  %s782_s12 = scalar_lea.sflag (!%p191_p9), [#allocation3], %s215_s11  ;;  %s796_s7 = int_to_ptr.vmem [resolvable:$true] %s795_s7 }
  0x11   : > { %s1071_s13 = scalar_lea.vmem (!%p191_p9), %s796_s7, 128 }
  0x12   : > { %p1072_p11 = scmp.ne.s32.totalorder (!%p191_p9), %s796_s7, %s1071_s13 }
  0x13   : > { %v1022_v0 = vld [vmem:[%s1424_s1 + $0x78] sm:$0xff]   ;;  %v1026_v4 = vld [vmem:[%s1424_s1 + $0x70] sm:$0xff]   ;;  %v1030_v8 = vld [vmem:[%s1424_s1 + $0x68] sm:$0xff]   ;;  %s219_s15 = scalar_select %p218_p10, %s1187_s22, 1  ;;  %v335_v27 = vlaneseq  ;;  %v1133_v35 = vmov 1983009808  }
  0x14   : > { %v1023_v1 = vld [vmem:[%s1424_s1 + $0x38] sm:$0xff]   ;;  %914 = vmatprep.subr.bf16.mxu0 %v1022_v0  ;;  %v1027_v5 = vld [vmem:[%s1424_s1 + $0x30] sm:$0xff]   ;;  %v1031_v9 = vld [vmem:[%s1424_s1 + $0x28] sm:$0xff]   ;;  %v333_v36 = vunpack.c.l.s4 %v1133_v35  ;;  %vm775_vm0 = vcmask 516096   ;;  %vm779_vm1 = vcmask 518144   ;;  %vm777_vm2 = vcmask 519168   ;;  %p1073_p12 = pnand %p1072_p11, %p1204_p5 }
  0x15   : > { %v1024_v2 = vld [vmem:[%s1424_s1 + $0xf8] sm:$0xff]   ;;  %915 = vmatpush3.bf16.msra.mxu0 %v1023_v1  ;;  %v1028_v6 = vld [vmem:[%s1424_s1 + $0xf0] sm:$0xff]   ;;  %v1032_v10 = vld [vmem:[%s1424_s1 + $0xe8] sm:$0xff]   ;;  %s980_s8 = smul.u32 12, %s219_s15  ;;  %v336_v32 = vshrl.u32 %v335_v27, 7  ;;  %v1134_v1 = vmov 0.0  }
  0x16   : > { %v1025_v3 = vld [vmem:[%s1424_s1 + $0xb8] sm:$0xff]   ;;  %936 = vmatprep.subr.bf16.mxu1 %v1024_v2  ;;  %916 = vmatprep.subr.bf16.mxu0 %v1026_v4  ;;  %v1029_v7 = vld [vmem:[%s1424_s1 + $0xb0] sm:$0xff]   ;;  %v1033_v11 = vld [vmem:[%s1424_s1 + $0xa8] sm:$0xff]   ;;  %v334_v38 = vunpack.c.0.s8 %v333_v36  ;;  %780 = vst.msk [vmem:[%s1376_s17 + $0x5] sm:$0x7] %vm779_vm1, %v1134_v1  ;;  %p1074_p13 = pneg %p1073_p12 }
  0x17   : > { %937 = vmatpush3.bf16.msra.mxu1 %v1025_v3  ;;  %v1034_v12 = vld [vmem:[%s1424_s1 + $0x60] sm:$0xff]   ;;  %v1038_v16 = vld [vmem:[%s1424_s1 + $0x58] sm:$0xff]   ;;  %v1042_v20 = vld [vmem:[%s1424_s1 + $0x50] sm:$0xff]   ;;  %s1306_s25 = scalar_lea.vmem %s1423_s0, %s980_s8  ;;  %s793_s8 = scalar_lea.hbm %s1428_s5, %s911_s6 }
  0x18   : > { %938 = vmatprep.subr.bf16.mxu1 %v1028_v6  ;;  %v1035_v13 = vld [vmem:[%s1424_s1 + $0x20] sm:$0xff]   ;;  %v1039_v17 = vld [vmem:[%s1424_s1 + $0x18] sm:$0xff]   ;;  %v1043_v21 = vld [vmem:[%s1424_s1 + $0x10] sm:$0xff]   ;;  %v337_v40 = vsub.s32 %v334_v38, %v336_v32 }
  0x19   : > { %917 = vmatpush3.bf16.msra.mxu0 %v1027_v5  ;;  %v1036_v14 = vld [vmem:[%s1424_s1 + $0xe0] sm:$0xff]   ;;  %v1040_v18 = vld [vmem:[%s1424_s1 + $0xd8] sm:$0xff]   ;;  %v1044_v22 = vld [vmem:[%s1424_s1 + $0xd0] sm:$0xff]  }
  0x1a   : > { %918 = vmatprep.subr.bf16.mxu0 %v1030_v8  ;;  %v1037_v15 = vld [vmem:[%s1424_s1 + $0xa0] sm:$0xff]   ;;  %v1041_v19 = vld [vmem:[%s1424_s1 + $0x98] sm:$0xff]   ;;  %v1045_v23 = vld [vmem:[%s1424_s1 + $0x90] sm:$0xff]  }
  0x1b   : > { %939 = vmatpush3.bf16.msra.mxu1 %v1029_v7  ;;  %v1046_v24 = vld [vmem:[%s1424_s1 + $0x48] sm:$0xff]   ;;  %v1050_v29 = vld [vmem:[%s1424_s1 + $0x40] sm:$0xff]   ;;  %v1054_v37 = vld [vmem:[%s1424_s1 + $0x178] sm:$0xff]  }
  0x1c   : > { %940 = vmatprep.subr.bf16.mxu1 %v1032_v10  ;;  %v1047_v25 = vld [vmem:[%s1424_s1 + $0x8] sm:$0xff]   ;;  %v1051_v30 = vld [vmem:[%s1424_s1] sm:$0xff]   ;;  %v1056_v45 = vld [vmem:[%s1424_s1 + $0x138] sm:$0xff]  }
  0x1d   : > { %919 = vmatpush3.bf16.msra.mxu0 %v1031_v9  ;;  %v1048_v26 = vld [vmem:[%s1424_s1 + $0xc8] sm:$0xff]   ;;  %v1052_v31 = vld [vmem:[%s1424_s1 + $0xc0] sm:$0xff]   ;;  %v1057_v46 = vld [vmem:[%s1424_s1 + $0x170] sm:$0xff]  }
  0x1e   : > { %920 = vmatprep.subr.bf16.mxu0 %v1034_v12  ;;  %v1049_v28 = vld [vmem:[%s1424_s1 + $0x88] sm:$0xff]   ;;  %v224_v33 = vld [vmem:[%s1306_s25] sm:$0xff]  ;;  %v1058_v47 = vld [vmem:[%s1424_s1 + $0x130] sm:$0xff]  }
  0x1f   : > { %941 = vmatpush3.bf16.msra.mxu1 %v1033_v11  ;;  %v1053_v34 = vld [vmem:[%s1424_s1 + $0x80] sm:$0xff]   ;;  %v331_v39 = vcombine.high %v224_v33, %v224_v33  ;;  %v338_v41 = vrot.slane %v224_v33, %v337_v40  ;;  %v1059_v48 = vld [vmem:[%s1424_s1 + $0x168] sm:$0xff]   ;;  %v1063_v54 = vld [vmem:[%s1424_s1 + $0x158] sm:$0xff]  }
  0x20   : > { %942 = vmatprep.subr.bf16.mxu1 %v1036_v14  ;;  %v1060_v49 = vld [vmem:[%s1424_s1 + $0x128] sm:$0xff]   ;;  %v1061_v51 = vld [vmem:[%s1424_s1 + $0x160] sm:$0xff]   ;;  %v1064_v55 = vld [vmem:[%s1424_s1 + $0x118] sm:$0xff]  }
  0x21   : > { %921 = vmatpush3.bf16.msra.mxu0 %v1035_v13  ;;  %v345_v42 = vrot.slane %v331_v39, %v337_v40  ;;  %v346_v43 = vcombine.high %v338_v41, %v338_v41  ;;  %v861_v50 = vld.sshfl [vmem:[%s1306_s25 + $0x8] sm:$0x33 pattern:$0x76325410]  ;;  %v1062_v53 = vld [vmem:[%s1424_s1 + $0x120] sm:$0xff]   ;;  %v1065_v56 = vld [vmem:[%s1424_s1 + $0x150] sm:$0xff]  }
  0x22   : > { %922 = vmatprep.subr.bf16.mxu0 %v1038_v16  ;;  %v355_v52 = vcombine.high %v861_v50, %v861_v50  ;;  %v1066_v57 = vld [vmem:[%s1424_s1 + $0x110] sm:$0xff]   ;;  %v1067_v58 = vld [vmem:[%s1424_s1 + $0x148] sm:$0xff]   ;;  %v1069_v60 = vld [vmem:[%s1424_s1 + $0x140] sm:$0xff]   ;;  %s1135_s25 = smov [#allocation2]  }
  0x23   : > { %943 = vmatpush3.bf16.msra.mxu1 %v1037_v15  ;;  %v347_v44 = vcombine.high %v345_v42, %v345_v42  ;;  %682 = vmatprep.mubr.bf16.mxu0 %v346_v43  ;;  %v1068_v59 = vld [vmem:[%s1424_s1 + $0x108] sm:$0xff]   ;;  %v1070_v61 = vld [vmem:[%s1424_s1 + $0x100] sm:$0xff]   ;;  %s1075_s22 = sshll.u32 %s1135_s25, 4  ;;  %s1076_s22 = int_to_ptr.vmem [resolvable:$false] %s1075_s22 }
  0x24   : > { %944 = vmatprep.subr.bf16.mxu1 %v1040_v18  ;;  %v772_v62 = vld [vmem:[%s1426_s3] sm:$0x1]  ;;  %v770_v18 = vld [vmem:[%s1427_s4 + $0x1] sm:$0xf]  ;;  %s1077_s14 = scalar_lea.vmem %s1076_s22, 256  ;;  %p1078_p0 = scmp.lt.s32.totalorder %s796_s7, %s1076_s22 }
  0x25   : > { %923 = vmatpush3.bf16.msra.mxu0 %v1039_v17  ;;  %722 = vmatprep.mubr.bf16.mxu1 %v347_v44  ;;  %v773_v63 = vld [vmem:[%s1427_s4] sm:$0x1]  ;;  %p1079_p1 = scmp.lt.s32.totalorder %s1077_s14, %s1071_s13 }
  0x26   : > { %924 = vmatprep.subr.bf16.mxu0 %v1042_v20  ;;  %v774_v0 = vadd.f32 %v773_v63, %v772_v62  ;;  %v860_v11 = vld [vmem:[%s1425_s2] ss:$0 sm:$0xff] }
  0x27   : > { %945 = vmatpush3.bf16.msra.mxu1 %v1041_v19  ;;  %p1080_p2 = por %p1079_p1, %p1078_p0 }
  0x28   : > { %946 = vmatprep.subr.bf16.mxu1 %v1044_v22  ;;  %776 = vst.msk [vmem:[%s1376_s17] sm:$0x1] %vm775_vm0, %v774_v0 }
  0x29   : > { %925 = vmatpush3.bf16.msra.mxu0 %v1043_v21  ;;  %p1081_p3 = pnand %p1080_p2, %p1074_p13 }
  0x2a   : > { %926 = vmatprep.subr.bf16.mxu0 %v1046_v24 }
  0x2b   : > { %947 = vmatpush3.bf16.msra.mxu1 %v1045_v23 }
  0x2c   : > { %948 = vmatprep.subr.bf16.mxu1 %v1048_v26 }
  0x2d   : > { %927 = vmatpush3.bf16.msra.mxu0 %v1047_v25 }
  0x2e   : > { %928 = vmatprep.subr.bf16.mxu0 %v1050_v29 }
  0x2f   : > { %949 = vmatpush3.bf16.msra.mxu1 %v1049_v28 }
  0x30   : > { %950 = vmatprep.subr.bf16.mxu1 %v1052_v31 }
  0x31   : > { %929 = vmatpush3.bf16.msra.mxu0 %v1051_v30 }
  0x32   : > { %958 = vmatprep.subr.bf16.mxu0 %v1054_v37 }
  0x33   : > { %951 = vmatpush3.bf16.msra.mxu1 %v1053_v34 }
  0x34   : > { %683 = vmatmul.mubr.bf16.vlgmr.msra.gmra.mxu0 %v338_v41 }
  0x35   : > { %959 = vmatpush3.bf16.msra.mxu0 %v1056_v45  ;;  %762 = vmatprep.mubr.bf16.mxu0 %v355_v52 }
  0x36   : > { %723 = vmatmul.mubr.bf16.vlgmr.msra.gmra.mxu1 %v345_v42  ;;  %960 = vmatprep.subr.bf16.mxu0 %v1057_v46 }
  0x39   : > { %961 = vmatpush3.bf16.msra.mxu0 %v1058_v47 }
  0x3a   : > { %962 = vmatprep.subr.bf16.mxu0 %v1059_v48 }
  0x3d   : > { %963 = vmatpush3.bf16.msra.mxu0 %v1060_v49 }
  0x3e   : > { %964 = vmatprep.subr.bf16.mxu0 %v1061_v51 }
  0x41   : > { %965 = vmatpush3.bf16.msra.mxu0 %v1062_v53 }
  0x42   : > { %966 = vmatprep.subr.bf16.mxu0 %v1063_v54 }
  0x45   : > { %967 = vmatpush3.bf16.msra.mxu0 %v1064_v55 }
  0x46   : > { %968 = vmatprep.subr.bf16.mxu0 %v1065_v56 }
  0x49   : > { %969 = vmatpush3.bf16.msra.mxu0 %v1066_v57 }
  0x4a   : > { %970 = vmatprep.subr.bf16.mxu0 %v1067_v58 }
  0x4d   : > { %971 = vmatpush3.bf16.msra.mxu0 %v1068_v59 }
  0x4e   : > { %972 = vmatprep.subr.bf16.mxu0 %v1069_v60 }
  0x51   : > { %973 = vmatpush3.bf16.msra.mxu0 %v1070_v61 }
  0x54   : > { %763 = vmatmul.mubr.bf16.vlgmr.msra.gmra.mxu0 %v861_v50 }
  0xf4   : > { %v930_v2 = vpop.f32.mrf.mxu0 }
  0xf6   : > { %v952_v3 = vpop.f32.mrf.mxu1  ;;  %v931_v4 = vpop.f32.mrf.mxu0 }
  0xf7   : > { %v932_v10 = vadd.f32 %v931_v4, %v930_v2 }
  0xf8   : > { %v953_v5 = vpop.f32.mrf.mxu1  ;;  %v933_v6 = vpop.f32.mrf.mxu0 }
  0xf9   : > { %v685_v12 = vadd.f32 %v932_v10, %v860_v11  ;;  %v954_v13 = vadd.f32 %v953_v5, %v952_v3 }
  0xfa   : > { %v955_v7 = vpop.f32.mrf.mxu1  ;;  %v934_v8 = vpop.f32.mrf.mxu0 }
  0xfb   : > { %v725_v16 = vadd.f32 %v954_v13, %v685_v12 }
  0xfc   : > { %v956_v9 = vpop.f32.mrf.mxu1 }
 0x114   : > { %v974_v14 = vpop.f32.mrf.mxu0 }
 0x116   : > { %v975_v15 = vpop.f32.mrf.mxu0 }
 0x117   : > { %v976_v17 = vadd.f32 %v975_v15, %v974_v14 }
 0x118   : > { %v977_v19 = vpop.f32.mrf.mxu0 }
 0x119   : > { %v765_v20 = vadd.f32 %v976_v17, %v725_v16 }
 0x11a   : > { %v978_v21 = vpop.f32.mrf.mxu0 }
 0x11b   : > { %v771_v22 = vadd.f32 %v770_v18, %v765_v20 }
 0x11d   : > { %778 = vst.msk [vmem:[%s1376_s17 + $0x1] sm:$0xf] %vm777_vm2, %v771_v22 }
 0x11e   : > { %1084 = shalt.err (!%p1081_p3)
}
 0x11f   : > { %s1085_s16 = scalar_lea.hbm %s793_s8, 128  ;;  %s1089_s15 = scalar_lea.hbm %s1428_s5, 256 }
 0x120   : > { %p1086_p4 = scmp.ne.s32.totalorder %s793_s8, %s1085_s16  ;;  %p1090_p9 = scmp.lt.s32.totalorder %s793_s8, %s1428_s5 }
 0x121   : > { %p1091_p10 = scmp.lt.s32.totalorder %s1089_s15, %s1085_s16 }
 0x122   : > { %p1087_p7 = pnand %p1086_p4, %p1204_p5 }
 0x123   : > { %p1092_p11 = por %p1091_p10, %p1090_p9 }
 0x124   : > { %p1088_p8 = pneg %p1087_p7 }
 0x126   : > { %p1093_p12 = pnand %p1092_p11, %p1088_p8 }
 0x128   : > { %1096 = shalt.err (!%p1093_p12)
}
 0x129   : > { %981 = dma.vmem_to_hbm [thread:$0]  (%p1204_p5), %s796_s7, 128, %s793_s8, %s782_s12  }
 0x12a PF: > { %p987_p13 = scmp.ge.s32.totalorder %s1131_s21, 2  ;;  %s807_s30 = sand.u32 1, %s1119_s18  }
 0x12b   : > { %s808_s6 = scalar_lea.sflag [#allocation3], %s807_s30 }
 0x12c   : > { %p984_p0 = pnand %p987_p13, %p1208_p6 }
 0x12e   : > { %p985_p1 = pneg %p984_p0 }
 0x130   : > { %1114 = dma.done.wait (%p985_p1), %s808_s6, 128  }
 0x131   : > { %1116 = vsyncadd (%p985_p1), %s808_s6, 4294967168  ;;  %p15_p2 = scmp.ge.s32.totalorder %s1191_s24, 4   ;;  %s1431_s18 = smov %s1123_s19 }
 0x132   : > { %s1432_s19 = smov %s1127_s20  ;;  %s1433_s20 = smov %s1202_s27 }
 0x133   : > { %s1434_s21 = smov %s1191_s24  ;;  %17 = sbr.rel (!%p15_p2) target bundleno = 3 (0x3), region = 75 }
 0x138   :  { %813 = vsyncpa [#allocation3], 1 }
 0x139   :  { %815 = vsyncpa [#allocation3 + $0x1], 1 }

</bundles_post_ra>
